<compile_context>
chip_gen: v7x
topology: tpu7x:2x2x1
jax: 0.10.0
libtpu: 0.0.40
codegen_flags: <defaults>
</compile_context>

<pallas_src>
import jax
import jax.numpy as jnp
from jax.experimental import pallas as pl
from jax.experimental.pallas import tpu as pltpu


def _cdiv(a, b):
    return (a + b - 1) // b


def _round_up(x, m):
    return _cdiv(x, m) * m


def _mock_env_encoder_kernel(x_ref, w1_ref, b1_ref, w2_ref, b2_ref, o_ref):
    x = x_ref[...]                                    # (tb, obs_dim) f32

    # l1 + ReLU  (MXU matmul, full-f32 precision for parity with torch fp32)
    h = jnp.dot(x, w1_ref[...],
                preferred_element_type=jnp.float32,
                precision=jax.lax.Precision.HIGHEST) + b1_ref[...]
    h = jnp.maximum(h, 0.0)

    # l2 + tanh  (tanh -> EUP transcendental slot)
    y = jnp.dot(h, w2_ref[...],
                preferred_element_type=jnp.float32,
                precision=jax.lax.Precision.HIGHEST) + b2_ref[...]
    o_ref[...] = jnp.tanh(y)


def _choose_batch_tile(batch, *, target_rows=4096, min_tiles=4):
    """Pick (tile_rows, padded_batch).

    ~target_rows rows per tile amortizes the ~0.35us/step grid overhead while
    keeping VMEM (~3 KiB/row of lane-padded buffers) well within every
    generation's budget; at least `min_tiles` grid steps are kept (when the
    batch is big enough) so the "parallel" axis can span v7x's two TCs.
    """
    b8 = _round_up(max(batch, 1), 8)
    n_tiles = max(_cdiv(b8, target_rows), min(min_tiles, b8 // 8))
    tb = _round_up(_cdiv(b8, n_tiles), 8)
    return tb, _round_up(b8, tb)


def mock_env_encoder(x, w1, b1, w2, b2):
    """Forward of MockEnvEncoder: tanh(relu(x @ w1 + b1) @ w2 + b2).

    x : (B, obs_dim)
    w1: (obs_dim, enc_dim)   (pre-transposed vs. PyTorch nn.Linear's (out, in))
    b1: (enc_dim,)
    w2: (enc_dim, enc_dim)
    b2: (enc_dim,)
    """
    x = jnp.asarray(x, jnp.float32)
    w1 = jnp.asarray(w1, jnp.float32)
    w2 = jnp.asarray(w2, jnp.float32)
    b1 = jnp.asarray(b1, jnp.float32).reshape(1, -1)
    b2 = jnp.asarray(b2, jnp.float32).reshape(1, -1)

    B, obs_dim = x.shape
    enc_dim = w1.shape[1]

    tb, b_p = _choose_batch_tile(B)
    if b_p != B:
        # Zero rows are numerically harmless and sliced off below.
        x = jnp.pad(x, ((0, b_p - B), (0, 0)))

    grid = (b_p // tb,)

    # Real (unpadded) work for the scheduler hint.
    flops = 2 * b_p * (obs_dim * enc_dim + enc_dim * enc_dim)
    bytes_accessed = 4 * (b_p * obs_dim + obs_dim * enc_dim
                          + enc_dim * enc_dim + 2 * enc_dim + b_p * enc_dim)

    out = pl.pallas_call(
        _mock_env_encoder_kernel,
        out_shape=jax.ShapeDtypeStruct((b_p, enc_dim), jnp.float32),
        grid=grid,
        in_specs=[
            pl.BlockSpec((tb, obs_dim), lambda i: (i, 0)),        # x: batch-tiled
            pl.BlockSpec((obs_dim, enc_dim), lambda i: (0, 0)),   # w1: resident
            pl.BlockSpec((1, enc_dim), lambda i: (0, 0)),         # b1: resident
            pl.BlockSpec((enc_dim, enc_dim), lambda i: (0, 0)),   # w2: resident
            pl.BlockSpec((1, enc_dim), lambda i: (0, 0)),         # b2: resident
        ],
        out_specs=pl.BlockSpec((tb, enc_dim), lambda i: (i, 0)),
        compiler_params=pltpu.CompilerParams(
            dimension_semantics=("parallel",),
            vmem_limit_bytes=32 * 1024 * 1024),
        cost_estimate=pl.CostEstimate(
            flops=flops,
            transcendentals=b_p * enc_dim,
            bytes_accessed=bytes_accessed),
    )(x, w1, b1, w2, b2)

    # Only the padded batch rows need slicing; lanes are already exact.
    return out[:B]


def _reference(x, w1, b1, w2, b2):
    h = jnp.maximum(
        jnp.dot(x, w1, precision=jax.lax.Precision.HIGHEST) + b1, 0.0)
    return jnp.tanh(jnp.dot(h, w2, precision=jax.lax.Precision.HIGHEST) + b2)


if __name__ == "__main__":
    observation_dim = 16
    encoding_dim = 20

    key = jax.random.PRNGKey(0)
    k_x, k_w1, k_b1, k_w2, k_b2, k_x2 = jax.random.split(key, 6)

    # Deterministic synthetic parameters (PyTorch Linear shapes, stored
    # pre-transposed as (in_features, out_features)).
    w1 = jax.random.normal(k_w1, (observation_dim, encoding_dim), jnp.float32) * 0.1
    b1 = jax.random.normal(k_b1, (encoding_dim,), jnp.float32) * 0.1
    w2 = jax.random.normal(k_w2, (encoding_dim, encoding_dim), jnp.float32) * 0.1
    b2 = jax.random.normal(k_b2, (encoding_dim,), jnp.float32) * 0.1

    # Small case (single grid step, batch padded 2 -> 8).
    x = jax.random.normal(k_x, (2, observation_dim), jnp.float32)
    out = jax.block_until_ready(mock_env_encoder(x, w1, b1, w2, b2))
    ref = _reference(x, w1, b1, w2, b2)
    assert out.shape == (2, encoding_dim)
    assert jnp.allclose(out, ref, atol=1e-5, rtol=1e-5)

    # Larger case exercising the multi-step grid + batch-tail padding path.
    x2 = jax.random.normal(k_x2, (300, observation_dim), jnp.float32)
    out2 = jax.block_until_ready(mock_env_encoder(x2, w1, b1, w2, b2))
    ref2 = _reference(x2, w1, b1, w2, b2)
    assert out2.shape == (300, encoding_dim)
    assert jnp.allclose(out2, ref2, atol=1e-5, rtol=1e-5)

    print("KERNEL_OK")
</pallas_src>

<mosaic_0001>
module attributes {stable_mosaic.version = 11 : i64} {
  func.func @_mock_env_encoder_kernel(%arg0: i32, %arg1: memref<8x16xf32, #tpu.memory_space<vmem>>, %arg2: memref<16x20xf32, #tpu.memory_space<vmem>>, %arg3: memref<1x20xf32, #tpu.memory_space<vmem>>, %arg4: memref<20x20xf32, #tpu.memory_space<vmem>>, %arg5: memref<1x20xf32, #tpu.memory_space<vmem>>, %arg6: memref<8x20xf32, #tpu.memory_space<vmem>>) attributes {dimension_semantics = [#tpu.dimension_semantics<parallel>], iteration_bounds = array<i64: 1>, scalar_prefetch = 0 : i64, scratch_operands = 0 : i64, tpu.core_type = #tpu.core_type<tc>, window_params = [{transform_indices = @transform_0, window_bounds = array<i64: 8, 16>}, {pipeline_mode = #tpu.pipeline_mode<synchronous>, transform_indices = @transform_1, window_bounds = array<i64: 16, 20>}, {pipeline_mode = #tpu.pipeline_mode<synchronous>, transform_indices = @transform_2, window_bounds = array<i64: 1, 20>}, {pipeline_mode = #tpu.pipeline_mode<synchronous>, transform_indices = @transform_3, window_bounds = array<i64: 20, 20>}, {pipeline_mode = #tpu.pipeline_mode<synchronous>, transform_indices = @transform_4, window_bounds = array<i64: 1, 20>}, {transform_indices = @transform_5, window_bounds = array<i64: 8, 20>}]} {
    %c0 = arith.constant 0 : index
    %c0_0 = arith.constant 0 : index
    %0 = vector.load %arg1[%c0, %c0_0] : memref<8x16xf32, #tpu.memory_space<vmem>>, vector<8x16xf32>
    %c0_1 = arith.constant 0 : index
    %c0_2 = arith.constant 0 : index
    %1 = vector.load %arg2[%c0_1, %c0_2] : memref<16x20xf32, #tpu.memory_space<vmem>>, vector<16x20xf32>
    %cst = arith.constant dense<0.000000e+00> : vector<8x20xf32>
    %2 = tpu.matmul %0, %1, %cst {dimension_numbers = #tpu.dot_dimension_numbers<[1], [0], [0], [1], [0, 0, 1, 1], [], []>, precision = #tpu.contract_precision<fp32>} : vector<8x16xf32>, vector<16x20xf32>, vector<8x20xf32> -> vector<8x20xf32>
    %c0_3 = arith.constant 0 : index
    %c0_4 = arith.constant 0 : index
    %3 = vector.load %arg3[%c0_3, %c0_4] : memref<1x20xf32, #tpu.memory_space<vmem>>, vector<1x20xf32>
    %4 = vector.broadcast %3 : vector<1x20xf32> to vector<8x20xf32>
    %5 = arith.addf %2, %4 : vector<8x20xf32>
    %cst_5 = arith.constant 0.000000e+00 : f32
    %6 = vector.broadcast %cst_5 : f32 to vector<8x20xf32>
    %7 = arith.maximumf %5, %6 : vector<8x20xf32>
    %c0_6 = arith.constant 0 : index
    %c0_7 = arith.constant 0 : index
    %8 = vector.load %arg4[%c0_6, %c0_7] : memref<20x20xf32, #tpu.memory_space<vmem>>, vector<20x20xf32>
    %cst_8 = arith.constant dense<0.000000e+00> : vector<8x20xf32>
    %9 = tpu.matmul %7, %8, %cst_8 {dimension_numbers = #tpu.dot_dimension_numbers<[1], [0], [0], [1], [0, 0, 1, 1], [], []>, precision = #tpu.contract_precision<fp32>} : vector<8x20xf32>, vector<20x20xf32>, vector<8x20xf32> -> vector<8x20xf32>
    %c0_9 = arith.constant 0 : index
    %c0_10 = arith.constant 0 : index
    %10 = vector.load %arg5[%c0_9, %c0_10] : memref<1x20xf32, #tpu.memory_space<vmem>>, vector<1x20xf32>
    %11 = vector.broadcast %10 : vector<1x20xf32> to vector<8x20xf32>
    %12 = arith.addf %9, %11 : vector<8x20xf32>
    %13 = math.tanh %12 : vector<8x20xf32>
    %c0_11 = arith.constant 0 : index
    %c0_12 = arith.constant 0 : index
    %14 = vector.load %arg6[%c0_11, %c0_12] : memref<8x20xf32, #tpu.memory_space<vmem>>, vector<8x20xf32>
    tpu.vector_store %arg6[%c0_11, %c0_12], %13 {strides = array<i32>} : memref<8x20xf32, #tpu.memory_space<vmem>>, vector<8x20xf32>,
    return
  }
  func.func @transform_0(%arg0: i32) -> (i32, i32) {
    %c0_i32 = arith.constant 0 : i32
    %c0_i32_0 = arith.constant 0 : i32
    return %arg0, %c0_i32 : i32, i32
  }
  func.func @transform_1(%arg0: i32) -> (i32, i32) {
    %c0_i32 = arith.constant 0 : i32
    %c0_i32_0 = arith.constant 0 : i32
    %c0_i32_1 = arith.constant 0 : i32
    return %c0_i32, %c0_i32_0 : i32, i32
  }
  func.func @transform_2(%arg0: i32) -> (i32, i32) {
    %c0_i32 = arith.constant 0 : i32
    %c0_i32_0 = arith.constant 0 : i32
    %c0_i32_1 = arith.constant 0 : i32
    return %c0_i32, %c0_i32_0 : i32, i32
  }
  func.func @transform_3(%arg0: i32) -> (i32, i32) {
    %c0_i32 = arith.constant 0 : i32
    %c0_i32_0 = arith.constant 0 : i32
    %c0_i32_1 = arith.constant 0 : i32
    return %c0_i32, %c0_i32_0 : i32, i32
  }
  func.func @transform_4(%arg0: i32) -> (i32, i32) {
    %c0_i32 = arith.constant 0 : i32
    %c0_i32_0 = arith.constant 0 : i32
    %c0_i32_1 = arith.constant 0 : i32
    return %c0_i32, %c0_i32_0 : i32, i32
  }
  func.func @transform_5(%arg0: i32) -> (i32, i32) {
    %c0_i32 = arith.constant 0 : i32
    %c0_i32_0 = arith.constant 0 : i32
    return %arg0, %c0_i32 : i32, i32
  }
}

</mosaic_0001>

<bundles_post_ra>
// kernel: tpu_custom_call.1
= control target key start
LH: loop header
LB: loop body
LE: loop exit
PB: predicated region body
PF: predicated region fallthrough
CT: control target
= control target key end

     0   :  { %10 = vsyncpa [#allocation3], 0  ;;  %s1487_s0 = inlined_call_operand.hbm [shape: f32[8,16], index: 0, kind: input, shape index: {}]   ;;  %s1488_s1 = inlined_call_operand.hbm [shape: f32[16,20], index: 1, kind: input, shape index: {}]   ;;  %s1489_s2 = inlined_call_operand.vmem [shape: f32[1,20], index: 2, kind: input, shape index: {}]   ;;  %s1490_s3 = inlined_call_operand.hbm [shape: f32[20,20], index: 3, kind: input, shape index: {}]   ;;  %s1491_s4 = inlined_call_operand.vmem [shape: f32[1,20], index: 4, kind: input, shape index: {}]   ;;  %s1492_s5 = inlined_call_operand.hbm [shape: f32[8,20], index: 5, kind: output, shape index: {}]  }
   0x1   :  { %11 = vsyncpa [#allocation6], 0 }
   0x2   :  { %12 = vsyncpa [#allocation4], 0  ;;  %s1344_s18 = smov [#allocation5]   ;;  %s1250_s22 = scalar_lea.hbm %s1488_s1, 256 }
   0x3   :  { %s28_s19 = sshll.u32 %s1344_s18, 4  ;;  %p1251_p0 = scmp.ne.s32.totalorder %s1488_s1, %s1250_s22  ;;  %s29_s19 = int_to_ptr.vmem [resolvable:$true] %s28_s19 }
   0x4   :  { %p1254_p1 = scmp.lt.u32.totalorder %s1250_s22, %s1488_s1 }
   0x6   :  { %p1256_p2 = pnand %p1254_p1, %p1251_p0 }
   0x8   :  { %1259 = shalt.err (!%p1256_p2)
}
   0x9   :  { %s1260_s27 = scalar_lea.vmem %s29_s19, 256  ;;  %p1265_p4 = scmp.lt.s32.totalorder %s29_s19, %s29_s19 }
   0xa   :  { %p1261_p3 = scmp.ne.s32.totalorder %s29_s19, %s1260_s27  ;;  %p1266_p5 = scmp.lt.s32.totalorder %s1260_s27, %s1260_s27 }
   0xc   :  { %p1267_p6 = por %p1266_p5, %p1265_p4 }
   0xe   :  { %p1268_p7 = pnand %p1267_p6, %p1261_p3 }
  0x10   :  { %1271 = shalt.err (!%p1268_p7)
}
  0x11   :  { %s1345_s28 = smov 128   ;;  %s1346_s29 = smov 8  }
  0x12   :  { %34 = dma.hbm_to_vmem [thread:$0]  %s1488_s1, 256, %s29_s19, [#allocation6], %s1345_s28, %s1345_s28, %s1346_s29  }
  0x13   :  { %s1347_s7 = smov [#allocation2]   ;;  %s1348_s9 = smov [#allocation7]  }
  0x14   :  { %s19_s8 = sshll.u32 %s1347_s7, 4  ;;  %s42_s10 = sshll.u32 %s1348_s9, 4  ;;  %s20_s8 = int_to_ptr.vmem [resolvable:$true] %s19_s8  ;;  %s43_s10 = int_to_ptr.vmem [resolvable:$true] %s42_s10 }
  0x15   :  { %s1272_s13 = scalar_lea.hbm %s1487_s0, 128 }
  0x16   :  { %p1273_p8 = scmp.ne.s32.totalorder %s1487_s0, %s1272_s13  ;;  %p1276_p9 = scmp.lt.u32.totalorder %s1272_s13, %s1487_s0 }
  0x18   :  { %p1278_p10 = pnand %p1276_p9, %p1273_p8 }
  0x1a   :  { %1281 = shalt.err (!%p1278_p10)
}
  0x1b   :  { %s1282_s1 = scalar_lea.vmem %s20_s8, 128  ;;  %p1287_p12 = scmp.lt.s32.totalorder %s20_s8, %s20_s8 }
  0x1c   :  { %p1283_p11 = scmp.ne.s32.totalorder %s20_s8, %s1282_s1  ;;  %p1288_p13 = scmp.lt.s32.totalorder %s1282_s1, %s1282_s1 }
  0x1e   :  { %p1289_p0 = por %p1288_p13, %p1287_p12 }
  0x20   :  { %p1290_p1 = pnand %p1289_p0, %p1283_p11 }
  0x22   :  { %1293 = shalt.err (!%p1290_p1)
}
  0x23   :  { %22 = dma.hbm_to_vmem [thread:$0]  %s1487_s0, 128, %s20_s8, [#allocation3]  }
  0x24   :  { %s1294_s22 = scalar_lea.hbm %s1490_s3, 384 }
  0x25   :  { %p1295_p2 = scmp.ne.s32.totalorder %s1490_s3, %s1294_s22  ;;  %p1298_p3 = scmp.lt.u32.totalorder %s1294_s22, %s1490_s3 }
  0x27   :  { %p1300_p4 = pnand %p1298_p3, %p1295_p2 }
  0x29   :  { %1303 = shalt.err (!%p1300_p4)
}
  0x2a   :  { %s1304_s27 = scalar_lea.vmem %s43_s10, 384  ;;  %p1309_p6 = scmp.lt.s32.totalorder %s43_s10, %s43_s10 }
  0x2b   :  { %p1305_p5 = scmp.ne.s32.totalorder %s43_s10, %s1304_s27  ;;  %p1310_p7 = scmp.lt.s32.totalorder %s1304_s27, %s1304_s27 }
  0x2d   :  { %p1311_p8 = por %p1310_p7, %p1309_p6 }
  0x2f   :  { %p1312_p9 = pnand %p1311_p8, %p1305_p5 }
  0x31   :  { %1315 = shalt.err (!%p1312_p9)
}
  0x32   :  { %48 = dma.hbm_to_vmem [thread:$0]  %s1490_s3, 384, %s43_s10, [#allocation6], %s1345_s28, %s1345_s28, %s1346_s29  }
  0x33   :  { %1338 = dma.done.wait [#allocation3], 128  }
  0x34   :  { %1339 = vsyncadd [#allocation3], 4294967168 }
  0x35   :  { %1340 = dma.done.wait [#allocation6], 640  }
  0x36   :  { %1341 = vsyncadd [#allocation6], 4294966656  ;;  %v1349_v0 = vmov 0.0|0.0   ;;  %vm1350_vm0 = vmmov 0   ;;  %v1351_v1 = vmov 0.0   ;;  %vm70_vm1 = vcmask 130048  }
  0x37   :  { %1182 = vmatprep.subr.bf16.mxu0 %v1349_v0  ;;  %1090 = vmatprep.mubr.msk.f32.mxu0 %vm1350_vm0, %v1351_v1  ;;  %v61_v2 = vld [vmem:[#allocation5] sm:$0xff]  ;;  %v62_v3 = vld [vmem:[#allocation5 + $0x8] sm:$0xff]  ;;  %v60_v4 = vld [vmem:[#allocation2] sm:$0xff]  ;;  %vm548_vm2 = vcmask 1043456   ;;  %vm544_vm3 = vcmask 162816   ;;  %s1352_s6 = smov [#allocation8]  }
  0x38   :  { %1203 = vmatprep.subr.bf16.mxu1 %v1349_v0  ;;  %1143 = vmatprep.mubr.msk.f32.mxu1 %vm1350_vm0, %v1351_v1  ;;  %v75_v5 = vand.u32 4294901760, %v61_v2  ;;  %v78_v6 = vand.u32 4294901760, %v62_v3  ;;  %v72_v7 = vsel %vm70_vm1, %v60_v4, 0  ;;  %v534_v25 = vld [vmem:[#allocation7] sm:$0xff]  ;;  %v535_v26 = vld [vmem:[#allocation7 + $0x8] sm:$0xff]  ;;  %s1032_s7 = sshll.u32 %s1352_s6, 4  ;;  %s1033_s7 = int_to_ptr.vmem [resolvable:$true] %s1032_s7 }
  0x39   :  { %v141_v8 = vand.u32 4294901760, %v72_v7  ;;  %v553_v27 = vand.u32 4294901760, %v534_v25  ;;  %v556_v28 = vand.u32 4294901760, %v535_v26  ;;  %v536_v33 = vld [vmem:[#allocation7 + $0x10] sm:$0xf]  ;;  %s1316_s8 = scalar_lea.vmem %s1033_s7, 128  ;;  %p1321_p11 = scmp.lt.s32.totalorder %s1033_s7, %s1033_s7 }
  0x3a   :  { %v1183_v9 = vpack.c.bf16 %v78_v6, %v75_v5  ;;  %v153_v10 = vsub.f32 %v61_v2, %v75_v5  ;;  %v160_v11 = vsub.f32 %v62_v3, %v78_v6  ;;  %v550_v34 = vsel %vm548_vm2, %v536_v33, 0  ;;  %v1042_v48 = vld [vmem:[%s1489_s2] ss:$0 sm:$0xff]  ;;  %p1317_p10 = scmp.ne.s32.totalorder %s1033_s7, %s1316_s8  ;;  %p1322_p12 = scmp.lt.s32.totalorder %s1316_s8, %s1316_s8 }
  0x3b   :  { %v142_v12 = vsub.f32 %v72_v7, %v141_v8  ;;  %v632_v29 = vsub.f32 %v534_v25, %v553_v27  ;;  %v639_v30 = vsub.f32 %v535_v26, %v556_v28  ;;  %v559_v37 = vand.u32 4294901760, %v550_v34  ;;  %v1043_v61 = vld [vmem:[%s1491_s4] ss:$0 sm:$0xff] }
  0x3c   :  { %1184 = vmatpush3.bf16.msra.mxu0 %v1183_v9  ;;  %v154_v13 = vand.u32 4294901760, %v153_v10  ;;  %v161_v14 = vand.u32 4294901760, %v160_v11  ;;  %v1189_v23 = vpack.c.bf16 %v160_v11, %v153_v10  ;;  %v1201_v46 = vpack.c.bf16 %v556_v28, %v553_v27  ;;  %p1323_p13 = por %p1322_p12, %p1321_p11 }
  0x3d   :  { %v143_v15 = vand.u32 4294901760, %v142_v12  ;;  %1185 = vmatprep.subr.bf16.mxu0 %v1349_v0  ;;  %v633_v31 = vand.u32 4294901760, %v632_v29  ;;  %v640_v32 = vand.u32 4294901760, %v639_v30  ;;  %v646_v40 = vsub.f32 %v550_v34, %v559_v37 }
  0x3e   :  { %v155_v16 = vsub.f32 %v153_v10, %v154_v13  ;;  %v162_v17 = vsub.f32 %v160_v11, %v161_v14  ;;  %v1195_v24 = vpack.c.bf16 %v161_v14, %v154_v13  ;;  %v1207_v45 = vpack.c.bf16 %v639_v30, %v632_v29  ;;  %p1324_p0 = pnand %p1323_p13, %p1317_p10 }
  0x3f   :  { %v144_v18 = vsub.f32 %v142_v12, %v143_v15  ;;  %v634_v35 = vsub.f32 %v632_v29, %v633_v31  ;;  %v641_v36 = vsub.f32 %v639_v30, %v640_v32  ;;  %v647_v42 = vand.u32 4294901760, %v646_v40 }
  0x40   :  { %v156_v19 = vand.u32 4294901760, %v155_v16  ;;  %v163_v20 = vand.u32 4294901760, %v162_v17  ;;  %v1213_v47 = vpack.c.bf16 %v640_v32, %v633_v31 }
  0x41   :  { %v145_v21 = vand.u32 4294901760, %v144_v18  ;;  %v635_v38 = vand.u32 4294901760, %v634_v35  ;;  %v642_v39 = vand.u32 4294901760, %v641_v36  ;;  %v648_v43 = vsub.f32 %v646_v40, %v647_v42 }
  0x42   :  { %v1186_v22 = vpack.c.bf16 %v163_v20, %v156_v19 }
  0x43   :  { %1091 = vmatmul.mubr.f32.vlgmr.msra.gmra.mrb[0].mxu0 %v145_v21  ;;  %v1204_v41 = vpack.c.bf16 %v642_v39, %v635_v38  ;;  %v649_v44 = vand.u32 4294901760, %v648_v43 }
  0x44   :  { %1187 = vmatpush3.bf16.msra.mxu0 %v1186_v22  ;;  %1097 = vmatprep.mubr.msk.f32.mxu0 %vm1350_vm0, %v1351_v1 }
  0x45   :  { %1188 = vmatprep.subr.bf16.mxu0 %v1349_v0  ;;  %1205 = vmatpush3.bf16.msra.mxu1 %v1204_v41 }
  0x46   :  { %1141 = vmatprep.subr.mxu1 %v1351_v1 }
  0x49   :  { %1142 = vmatpush3.msra.mxu1 %v649_v44 }
  0x4a   :  { %1206 = vmatprep.subr.bf16.mxu1 %v1349_v0 }
  0x4b   :  { %1098 = vmatmul.mubr.f32.vlgmr.msra.gmra.mrb[0].mxu0 %v141_v8 }
  0x4c   :  { %1190 = vmatpush3.bf16.msra.mxu0 %v1189_v23  ;;  %1104 = vmatprep.mubr.msk.f32.mxu0 %vm1350_vm0, %v1351_v1 }
  0x4d   :  { %1191 = vmatprep.subr.bf16.mxu0 %v1349_v0 }
  0x53   :  { %1105 = vmatmul.mubr.f32.vlgmr.msra.gmra.mrb[0].mxu0 %v142_v12 }
  0x54   :  { %1193 = vmatpush3.bf16.msra.mxu0 %v1183_v9  ;;  %1111 = vmatprep.mubr.msk.f32.mxu0 %vm1350_vm0, %v1351_v1 }
  0x55   :  { %1194 = vmatprep.subr.bf16.mxu0 %v1349_v0 }
  0x5b   :  { %1112 = vmatmul.mubr.f32.vlgmr.msra.gmra.mrb[0].mxu0 %v143_v15 }
  0x5c   :  { %1196 = vmatpush3.bf16.msra.mxu0 %v1195_v24  ;;  %1118 = vmatprep.mubr.msk.f32.mxu0 %vm1350_vm0, %v1351_v1 }
  0x5d   :  { %1197 = vmatprep.subr.bf16.mxu0 %v1349_v0 }
  0x63   :  { %1119 = vmatmul.mubr.f32.vlgmr.msra.gmra.mrb[0].mxu0 %v141_v8 }
  0x64   :  { %1199 = vmatpush3.bf16.msra.mxu0 %v1183_v9  ;;  %1125 = vmatprep.mubr.msk.f32.mxu0 %vm1350_vm0, %v1351_v1 }
  0x65   :  { %1200 = vmatprep.subr.bf16.mxu0 %v1349_v0 }
  0x6b   :  { %1126 = vmatmul.mubr.f32.vlgmr.msra.gmra.mrb[0].mxu0 %v141_v8 }
  0x6c   :  { %1134 = vmatprep.mubr.msk.f32.mxu0 %vm1350_vm0, %v1351_v1  ;;  %1202 = vmatpush3.bf16.msra.mxu0 %v1201_v46 }
  0x6d   :  { %1132 = vmatprep.subr.mxu0 %v1351_v1 }
  0x70   :  { %1133 = vmatpush3.msra.mxu0 %v559_v37 }
 0x13e   :  { %v529_v49 = vpop.f32.mrb[0].mxu0 }
 0x13f   :  { %v1218_v50 = vadd.f32 %v1042_v48, %v529_v49  ;;  %v1127_v51 = vpop.f32.mrb[1].mxu0 }
 0x141   :  { %v533_v52 = vmax.f32 %v1218_v50, 0.0 }
 0x143   :  { %v546_v53 = vsel %vm544_vm3, %v533_v52, 0 }
 0x144   :  { %v620_v54 = vand.u32 4294901760, %v546_v53 }
 0x146   :  { %v621_v55 = vsub.f32 %v546_v53, %v620_v54  ;;  %1144 = vmatmul.mubr.f32.vlgmr.msra.gmra.mrb[0].mxu1 %v620_v54 }
 0x147   :  { %1208 = vmatpush3.bf16.msra.mxu1 %v1207_v45  ;;  %1152 = vmatprep.mubr.msk.f32.mxu1 %vm1350_vm0, %v1351_v1 }
 0x148   :  { %v622_v56 = vand.u32 4294901760, %v621_v55  ;;  %1150 = vmatprep.subr.mxu1 %v1351_v1 }
 0x14a   :  { %v623_v57 = vsub.f32 %v621_v55, %v622_v56 }
 0x14b   :  { %1151 = vmatpush3.msra.mxu1 %v646_v40 }
 0x14c   :  { %v624_v58 = vand.u32 4294901760, %v623_v57  ;;  %1209 = vmatprep.subr.bf16.mxu1 %v1349_v0 }
 0x14e   :  { %1135 = vmatmul.mubr.f32.vlgmr.msra.gmra.mrb[2].mxu0 %v624_v58  ;;  %1153 = vmatmul.mubr.f32.vlgmr.msra.gmra.mrb[0].mxu1 %v621_v55 }
 0x14f   :  { %1211 = vmatpush3.bf16.msra.mxu1 %v1201_v46  ;;  %1161 = vmatprep.mubr.msk.f32.mxu1 %vm1350_vm0, %v1351_v1 }
 0x150   :  { %1159 = vmatprep.subr.mxu1 %v1351_v1 }
 0x153   :  { %1160 = vmatpush3.msra.mxu1 %v559_v37 }
 0x154   :  { %1212 = vmatprep.subr.bf16.mxu1 %v1349_v0 }
 0x156   :  { %1162 = vmatmul.mubr.f32.vlgmr.msra.gmra.mrb[0].mxu1 %v622_v56 }
 0x157   :  { %1214 = vmatpush3.bf16.msra.mxu1 %v1213_v47  ;;  %1170 = vmatprep.mubr.msk.f32.mxu1 %vm1350_vm0, %v1351_v1 }
 0x158   :  { %1168 = vmatprep.subr.mxu1 %v1351_v1 }
 0x15b   :  { %1169 = vmatpush3.msra.mxu1 %v647_v42 }
 0x15c   :  { %1215 = vmatprep.subr.bf16.mxu1 %v1349_v0 }
 0x15e   :  { %1171 = vmatmul.mubr.f32.vlgmr.msra.gmra.mrb[0].mxu1 %v620_v54 }
 0x15f   :  { %1217 = vmatpush3.bf16.msra.mxu1 %v1201_v46  ;;  %1179 = vmatprep.mubr.msk.f32.mxu1 %vm1350_vm0, %v1351_v1 }
 0x160   :  { %1177 = vmatprep.subr.mxu1 %v1351_v1 }
 0x163   :  { %1178 = vmatpush3.msra.mxu1 %v559_v37 }
 0x166   :  { %1180 = vmatmul.mubr.f32.vlgmr.msra.gmra.mrb[0].mxu1 %v620_v54 }
 0x221   :  { %v626_v59 = vpop.f32.mrb[2].mxu0 }
 0x222   :  { %v1136_v60 = vpop.f32.mrb[3].mxu0  ;;  %v627_v62 = vadd.f32 %v1043_v61, %v626_v59 }
 0x239   :  { %v1020_v63 = vpop.f32.mrb[0].mxu1 }
 0x23a   :  { %v1220_v2 = vadd.f32 %v1020_v63, %v627_v62  ;;  %v1181_v3 = vpop.f32.mrb[1].mxu1 }
 0x23c   :  { %1248 = vtanh.f32 %v1220_v2 }
 0x246   :  { %v1249_v0 = vpop.eup %1248 }
 0x247   :  { %1025 = vst.msk [vmem:[#allocation8] sm:$0xff] %vm544_vm3, %v1249_v0 }
 0x248   :  { %1327 = shalt.err (!%p1324_p0)
}
 0x249   :  { %s1328_s10 = scalar_lea.hbm %s1492_s5, 128 }
 0x24a   :  { %p1329_p1 = scmp.ne.s32.totalorder %s1492_s5, %s1328_s10  ;;  %p1332_p2 = scmp.lt.u32.totalorder %s1328_s10, %s1492_s5 }
 0x24c   :  { %p1334_p3 = pnand %p1332_p2, %p1329_p1 }
 0x24e   :  { %1337 = shalt.err (!%p1334_p3)
}
 0x24f   :  { %1035 = dma.vmem_to_hbm [thread:$0]  %s1033_s7, 128, %s1492_s5, [#allocation4]  }
 0x250   :  { %1342 = dma.done.wait [#allocation4], 128  }
 0x251   :  { %1343 = vsyncadd [#allocation4], 4294967168 }
 0x252   :  { %1039 = vsyncpa [#allocation3], 1 }
 0x253   :  { %1040 = vsyncpa [#allocation6], 1 }
 0x254   :  { %1041 = vsyncpa [#allocation4], 1 }

</bundles_post_ra>
